<compile_context>
chip_gen: v7x
topology: tpu7x:2x2x1
jax: 0.10.0
libtpu: 0.0.40
codegen_flags: <defaults>
</compile_context>

<pallas_src>
import jax
import jax.numpy as jnp
import numpy as np
from jax.experimental import pallas as pl
from jax.experimental.pallas import tpu as pltpu


def _round_up(x, m):
    return (x + m - 1) // m * m


# ---------------------------------------------------------------------------
# Kernel A (small vocab): token table resident in VMEM; gather is pure vld/vst.
# ---------------------------------------------------------------------------
def _make_vmem_gather_kernel(rows_per_tile, n_sblk, unroll=8):
    assert rows_per_tile % unroll == 0

    def kernel(ids_smem, tbl_ref, pos_ref, out_ref):
        # ids_smem : (B_pad*S_pad,)  int32 SMEM (scalar prefetch)
        # tbl_ref  : (V_pad, E_pad)  f32 VMEM, constant block index (resident)
        # pos_ref  : (R, E_pad)      f32 VMEM block (constant across batch sweep)
        # out_ref  : (R, E_pad)      f32 VMEM output block
        s = pl.program_id(0)
        b = pl.program_id(1)
        base = (b * n_sblk + s) * rows_per_tile

        def body(i, carry):
            t0 = i * unroll
            for u in range(unroll):          # manual unroll -> LLO sees `unroll` rows at once
                t = t0 + u
                tok = ids_smem[base + t]
                out_ref[pl.ds(t, 1), :] = tbl_ref[pl.ds(tok, 1), :]
            return carry

        jax.lax.fori_loop(0, rows_per_tile // unroll, body, 0)

        # One full-tile add over unmasked (8,128) vregs instead of R tiny adds.
        out_ref[...] = out_ref[...] + pos_ref[...]

    return kernel


# ---------------------------------------------------------------------------
# Kernel B (large vocab): table stays in HBM; per-row DMAs land directly in the
# output block with an n_inflight-deep pipeline; single full-tile pos add.
# ---------------------------------------------------------------------------
def _make_hbm_gather_kernel(rows_per_tile, n_sblk, n_inflight, unroll=4):
    assert n_inflight & (n_inflight - 1) == 0          # power of two
    assert rows_per_tile >= n_inflight
    assert (rows_per_tile - n_inflight) % unroll == 0

    def kernel(ids_smem, tbl_hbm, pos_ref, out_ref, sems):
        # tbl_hbm : (V_pad, E_pad) f32 raw HBM ref (memory_space=pl.ANY)
        # sems    : (n_inflight,)  DMA semaphores
        s = pl.program_id(0)
        b = pl.program_id(1)
        base = (b * n_sblk + s) * rows_per_tile

        def start_row(t, slot):
            tok = ids_smem[base + t]
            pltpu.make_async_copy(
                tbl_hbm.at[pl.ds(tok, 1), :],
                out_ref.at[pl.ds(t, 1), :],
                sems.at[slot],
            ).start()

        def wait_one(slot):
            # Shape-only descriptor: every copy moves exactly one (1, E_pad) row,
            # so the wait amount matches any started copy.  Keep this shape in
            # lock-step with start_row (noted correctness concern).
            pltpu.make_async_copy(
                tbl_hbm.at[pl.ds(0, 1), :],
                out_ref.at[pl.ds(0, 1), :],
                sems.at[slot],
            ).wait()

        # Prime: n_inflight row copies in flight (distinct slots 0..n_inflight-1).
        for t in range(n_inflight):
            start_row(t, t)

        # Steady state: wait for the copy previously issued on this slot, reissue.
        if rows_per_tile > n_inflight:
            n_steps = (rows_per_tile - n_inflight) // unroll

            def steady(i, carry):
                t0 = n_inflight + i * unroll
                for u in range(unroll):
                    t = t0 + u
                    slot = t & (n_inflight - 1)
                    tok = ids_smem[base + t]        # scalar read BEFORE the wait
                    wait_one(slot)
                    pltpu.make_async_copy(
                        tbl_hbm.at[pl.ds(tok, 1), :],
                        out_ref.at[pl.ds(t, 1), :],
                        sems.at[slot],
                    ).start()
                return carry

            jax.lax.fori_loop(0, n_steps, steady, 0)

        # Drain the last n_inflight outstanding copies.
        for i in range(n_inflight):
            t = rows_per_tile - n_inflight + i
            wait_one(t % n_inflight)

        # Single full-tile VPU add.
        out_ref[...] = out_ref[...] + pos_ref[...]

    return kernel


def embeddings_forward(
    ids,
    token_table,
    pos_table,
    *,
    rows_per_tile=256,
    vmem_table_bytes=2 * 1024 * 1024,
    force_hbm_gather=False,
):
    """ids: (B, S) int; token_table: (V, E) f32; pos_table: (max_len, E) f32 -> (B, S, E) f32."""
    B, S = ids.shape
    V, E = token_table.shape
    max_len = pos_table.shape[0]
    assert S <= max_len, f"sequence length {S} exceeds positional table max_len {max_len}"

    # ---------------- layout plumbing (plain JAX glue) ----------------
    E_pad = _round_up(E, 128)                       # lane-dense stores
    V_pad = _round_up(V, 8)

    # Cap tile rows so out+pos double-buffers stay well under v7x's 64 MiB VMEM.
    max_rows_by_vmem = max(8, (((4 << 20) // (E_pad * 4)) // 8) * 8)
    rows_per_tile = max(8, min(rows_per_tile, max_rows_by_vmem))

    S_pad = _round_up(S, 8)
    if S_pad >= rows_per_tile:
        TQ = rows_per_tile                          # tile = TQ sequence rows of one batch
        S_pad = _round_up(S, TQ)
        TB = 1
    else:
        # Small S: pack TB whole batch elements into one tile so grid steps stay chunky.
        TB = max(1, min(B, rows_per_tile // S_pad))
        TQ = S_pad
    R = TB * TQ                                     # rows per tile (multiple of 8)
    n_sblk = S_pad // TQ
    B_pad = _round_up(B, TB)

    # Guard SMEM footprint of the scalar-prefetched ids (1-D array pads to next_pow2(4N) bytes).
    assert B_pad * S_pad <= (1 << 18), (
        "ids too large for SMEM scalar prefetch"
    )  # TODO(synk): chunk ids via per-block DMA from HBM for very large B*S.

    # Clamp ids so a bad id cannot cause an out-of-bounds gather (nn.Embedding would raise).
    ids32 = jnp.clip(ids.astype(jnp.int32), 0, V - 1)
    ids_flat = jnp.pad(ids32, ((0, B_pad - B), (0, S_pad - S))).reshape(-1)   # (B_pad*S_pad,)

    tbl = jnp.pad(token_table.astype(jnp.float32), ((0, V_pad - V), (0, E_pad - E)))
    pos = jnp.pad(pos_table[:S].astype(jnp.float32), ((0, S_pad - S), (0, E_pad - E)))
    if TB > 1:
        pos = jnp.tile(pos, (TB, 1))                # (R, E_pad), repeated per packed batch row
    # pos now has shape (n_sblk * R, E_pad).

    table_bytes = V_pad * E_pad * 4
    use_vmem_table = (not force_hbm_gather) and (table_bytes <= vmem_table_bytes)

    # Explicit VMEM budget -> vmem_limit_bytes (v7x has only 64 MiB physical).
    tile_bytes = R * E_pad * 4
    vmem_need = 4 * tile_bytes                      # out (2 bufs) + pos (2 bufs)
    if use_vmem_table:
        vmem_need += 2 * table_bytes
    vmem_limit = min(64 * 1024 * 1024, max(32 * 1024 * 1024, 2 * vmem_need + (2 << 20)))

    pos_spec = pl.BlockSpec((R, E_pad), lambda s, b, ids: (s, 0))
    out_spec = pl.BlockSpec((R, E_pad), lambda s, b, ids: (b * n_sblk + s, 0))

    if use_vmem_table:
        kernel = _make_vmem_gather_kernel(R, n_sblk, unroll=8)
        tbl_spec = pl.BlockSpec((V_pad, E_pad), lambda s, b, ids: (0, 0))  # resident in VMEM
        scratch = []
    else:
        n_inflight = 16 if R >= 16 else 8
        kernel = _make_hbm_gather_kernel(R, n_sblk, n_inflight, unroll=4)
        tbl_spec = pl.BlockSpec(memory_space=pl.ANY)                        # table stays in HBM
        scratch = [pltpu.SemaphoreType.DMA((n_inflight,))]

    out = pl.pallas_call(
        kernel,
        out_shape=jax.ShapeDtypeStruct((B_pad * S_pad, E_pad), jnp.float32),
        grid_spec=pltpu.PrefetchScalarGridSpec(
            num_scalar_prefetch=1,                  # ids -> SMEM
            grid=(n_sblk, B_pad // TB),             # seq-block outer => pos block reused over batch
            in_specs=[tbl_spec, pos_spec],
            out_specs=out_spec,
            scratch_shapes=scratch,
        ),
        compiler_params=pltpu.CompilerParams(
            dimension_semantics=("parallel", "parallel"),
            vmem_limit_bytes=vmem_limit,
        ),
    )(ids_flat, tbl, pos)

    return out.reshape(B_pad, S_pad, E_pad)[:B, :S, :E]


def make_sinusoidal_pos_table(max_len, d_model):
    """Standard transformer sinusoidal positional embedding table (max_len, d_model)."""
    pos = np.arange(max_len, dtype=np.float32)[:, None]          # (L, 1)
    i = np.arange(0, d_model, 2, dtype=np.float32)[None, :]      # (1, E/2)
    div = np.exp(-np.log(10000.0) * i / d_model)
    pe = np.zeros((max_len, d_model), dtype=np.float32)
    pe[:, 0::2] = np.sin(pos * div)
    pe[:, 1::2] = np.cos(pos * div)
    return jnp.asarray(pe)


if __name__ == "__main__":
    # --- Config 1: small synthetic config (mirrors config.vocab_size / embed_size / maxlen) ---
    B, S = 2, 8
    VOCAB_SIZE = 16
    EMBED_SIZE = 32
    MAX_LEN = 16
    PAD_ID = 0          # vocab.token2idx[vocab.PAD]

    key = jax.random.PRNGKey(0)
    k_tbl, k_ids, k_tbl2, k_ids2 = jax.random.split(key, 4)

    token_table = jax.random.normal(k_tbl, (VOCAB_SIZE, EMBED_SIZE), jnp.float32) * 0.02
    token_table = token_table.at[PAD_ID].set(0.0)   # nn.Embedding padding_idx row
    pos_table = make_sinusoidal_pos_table(MAX_LEN, EMBED_SIZE)

    ids = jax.random.randint(k_ids, (B, S), 0, VOCAB_SIZE, dtype=jnp.int32)
    ids = ids.at[:, -2:].set(PAD_ID)

    ref = token_table[ids] + pos_table[:S][None, :, :]

    # Fast path (VMEM-resident table).
    out_fast = jax.block_until_ready(embeddings_forward(ids, token_table, pos_table))
    np.testing.assert_allclose(np.asarray(out_fast), np.asarray(ref), rtol=1e-6, atol=1e-6)
    assert out_fast.shape == (B, S, EMBED_SIZE) and out_fast.dtype == jnp.float32

    # HBM gather path (forced) — exercises the deep direct-to-output DMA pipeline.
    out_hbm = jax.block_until_ready(
        embeddings_forward(ids, token_table, pos_table, force_hbm_gather=True)
    )
    np.testing.assert_allclose(np.asarray(out_hbm), np.asarray(ref), rtol=1e-6, atol=1e-6)

    # --- Config 2: larger seq so the multi-tile (n_sblk > 1) path is exercised ---
    B2, S2, V2, E2, L2 = 3, 300, 1000, 96, 512
    tbl2 = jax.random.normal(k_tbl2, (V2, E2), jnp.float32) * 0.02
    tbl2 = tbl2.at[PAD_ID].set(0.0)
    pos2 = make_sinusoidal_pos_table(L2, E2)
    ids2 = jax.random.randint(k_ids2, (B2, S2), 0, V2, dtype=jnp.int32)
    ref2 = tbl2[ids2] + pos2[:S2][None, :, :]

    out2a = jax.block_until_ready(embeddings_forward(ids2, tbl2, pos2))
    np.testing.assert_allclose(np.asarray(out2a), np.asarray(ref2), rtol=1e-6, atol=1e-6)
    out2b = jax.block_until_ready(embeddings_forward(ids2, tbl2, pos2, force_hbm_gather=True))
    np.testing.assert_allclose(np.asarray(out2b), np.asarray(ref2), rtol=1e-6, atol=1e-6)

    print("KERNEL_OK")
</pallas_src>

<mosaic_0001>
module attributes {stable_mosaic.version = 11 : i64} {
  func.func @kernel(%arg0: i32, %arg1: i32, %arg2: memref<16xi32, #tpu.memory_space<smem>>, %arg3: memref<16x128xf32, #tpu.memory_space<vmem>>, %arg4: memref<16x128xf32, #tpu.memory_space<vmem>>, %arg5: memref<16x128xf32, #tpu.memory_space<vmem>>) attributes {dimension_semantics = [#tpu.dimension_semantics<parallel>, #tpu.dimension_semantics<parallel>], iteration_bounds = array<i64: 1, 1>, scalar_prefetch = 1 : i64, scratch_operands = 0 : i64, tpu.core_type = #tpu.core_type<tc>, window_params = [{pipeline_mode = #tpu.pipeline_mode<synchronous>, transform_indices = @transform_0, window_bounds = array<i64: 16, 128>}, {transform_indices = @transform_1, window_bounds = array<i64: 16, 128>}, {transform_indices = @transform_2, window_bounds = array<i64: 16, 128>}]} {
    %c1_i32 = arith.constant 1 : i32
    %0 = arith.muli %arg1, %c1_i32 : i32
    %1 = arith.addi %0, %arg0 : i32
    %c16_i32 = arith.constant 16 : i32
    %2 = arith.muli %1, %c16_i32 : i32
    %c0_i32 = arith.constant 0 : i32
    %c2_i32 = arith.constant 2 : i32
    %3 = arith.addi %c0_i32, %c2_i32 : i32
    %c1_i32_0 = arith.constant 1 : i32
    scf.for %arg6 = %c0_i32 to %3 step %c1_i32_0  : i32 {
      %c8_i32 = arith.constant 8 : i32
      %8 = arith.muli %arg6, %c8_i32 : i32
      %c0_i32_7 = arith.constant 0 : i32
      %9 = arith.addi %8, %c0_i32_7 : i32
      %10 = arith.addi %2, %9 : i32
      %11 = arith.index_cast %10 : i32 to index
      %12 = memref.load %arg2[%11] : memref<16xi32, #tpu.memory_space<smem>>
      %13 = arith.index_cast %12 : i32 to index
      %c0_8 = arith.constant 0 : index
      %14 = vector.load %arg3[%13, %c0_8] : memref<16x128xf32, #tpu.memory_space<vmem>>, vector<1x128xf32>
      %15 = arith.index_cast %9 : i32 to index
      %c0_9 = arith.constant 0 : index
      %16 = vector.load %arg5[%15, %c0_9] : memref<16x128xf32, #tpu.memory_space<vmem>>, vector<1x128xf32>
      tpu.vector_store %arg5[%15, %c0_9], %14 {strides = array<i32>} : memref<16x128xf32, #tpu.memory_space<vmem>>, vector<1x128xf32>,
      %c1_i32_10 = arith.constant 1 : i32
      %17 = arith.addi %8, %c1_i32_10 : i32
      %18 = arith.addi %2, %17 : i32
      %19 = arith.index_cast %18 : i32 to index
      %20 = memref.load %arg2[%19] : memref<16xi32, #tpu.memory_space<smem>>
      %21 = arith.index_cast %20 : i32 to index
      %c0_11 = arith.constant 0 : index
      %22 = vector.load %arg3[%21, %c0_11] : memref<16x128xf32, #tpu.memory_space<vmem>>, vector<1x128xf32>
      %23 = arith.index_cast %17 : i32 to index
      %c0_12 = arith.constant 0 : index
      %24 = vector.load %arg5[%23, %c0_12] : memref<16x128xf32, #tpu.memory_space<vmem>>, vector<1x128xf32>
      tpu.vector_store %arg5[%23, %c0_12], %22 {strides = array<i32>} : memref<16x128xf32, #tpu.memory_space<vmem>>, vector<1x128xf32>,
      %c2_i32_13 = arith.constant 2 : i32
      %25 = arith.addi %8, %c2_i32_13 : i32
      %26 = arith.addi %2, %25 : i32
      %27 = arith.index_cast %26 : i32 to index
      %28 = memref.load %arg2[%27] : memref<16xi32, #tpu.memory_space<smem>>
      %29 = arith.index_cast %28 : i32 to index
      %c0_14 = arith.constant 0 : index
      %30 = vector.load %arg3[%29, %c0_14] : memref<16x128xf32, #tpu.memory_space<vmem>>, vector<1x128xf32>
      %31 = arith.index_cast %25 : i32 to index
      %c0_15 = arith.constant 0 : index
      %32 = vector.load %arg5[%31, %c0_15] : memref<16x128xf32, #tpu.memory_space<vmem>>, vector<1x128xf32>
      tpu.vector_store %arg5[%31, %c0_15], %30 {strides = array<i32>} : memref<16x128xf32, #tpu.memory_space<vmem>>, vector<1x128xf32>,
      %c3_i32 = arith.constant 3 : i32
      %33 = arith.addi %8, %c3_i32 : i32
      %34 = arith.addi %2, %33 : i32
      %35 = arith.index_cast %34 : i32 to index
      %36 = memref.load %arg2[%35] : memref<16xi32, #tpu.memory_space<smem>>
      %37 = arith.index_cast %36 : i32 to index
      %c0_16 = arith.constant 0 : index
      %38 = vector.load %arg3[%37, %c0_16] : memref<16x128xf32, #tpu.memory_space<vmem>>, vector<1x128xf32>
      %39 = arith.index_cast %33 : i32 to index
      %c0_17 = arith.constant 0 : index
      %40 = vector.load %arg5[%39, %c0_17] : memref<16x128xf32, #tpu.memory_space<vmem>>, vector<1x128xf32>
      tpu.vector_store %arg5[%39, %c0_17], %38 {strides = array<i32>} : memref<16x128xf32, #tpu.memory_space<vmem>>, vector<1x128xf32>,
      %c4_i32 = arith.constant 4 : i32
      %41 = arith.addi %8, %c4_i32 : i32
      %42 = arith.addi %2, %41 : i32
      %43 = arith.index_cast %42 : i32 to index
      %44 = memref.load %arg2[%43] : memref<16xi32, #tpu.memory_space<smem>>
      %45 = arith.index_cast %44 : i32 to index
      %c0_18 = arith.constant 0 : index
      %46 = vector.load %arg3[%45, %c0_18] : memref<16x128xf32, #tpu.memory_space<vmem>>, vector<1x128xf32>
      %47 = arith.index_cast %41 : i32 to index
      %c0_19 = arith.constant 0 : index
      %48 = vector.load %arg5[%47, %c0_19] : memref<16x128xf32, #tpu.memory_space<vmem>>, vector<1x128xf32>
      tpu.vector_store %arg5[%47, %c0_19], %46 {strides = array<i32>} : memref<16x128xf32, #tpu.memory_space<vmem>>, vector<1x128xf32>,
      %c5_i32 = arith.constant 5 : i32
      %49 = arith.addi %8, %c5_i32 : i32
      %50 = arith.addi %2, %49 : i32
      %51 = arith.index_cast %50 : i32 to index
      %52 = memref.load %arg2[%51] : memref<16xi32, #tpu.memory_space<smem>>
      %53 = arith.index_cast %52 : i32 to index
      %c0_20 = arith.constant 0 : index
      %54 = vector.load %arg3[%53, %c0_20] : memref<16x128xf32, #tpu.memory_space<vmem>>, vector<1x128xf32>
      %55 = arith.index_cast %49 : i32 to index
      %c0_21 = arith.constant 0 : index
      %56 = vector.load %arg5[%55, %c0_21] : memref<16x128xf32, #tpu.memory_space<vmem>>, vector<1x128xf32>
      tpu.vector_store %arg5[%55, %c0_21], %54 {strides = array<i32>} : memref<16x128xf32, #tpu.memory_space<vmem>>, vector<1x128xf32>,
      %c6_i32 = arith.constant 6 : i32
      %57 = arith.addi %8, %c6_i32 : i32
      %58 = arith.addi %2, %57 : i32
      %59 = arith.index_cast %58 : i32 to index
      %60 = memref.load %arg2[%59] : memref<16xi32, #tpu.memory_space<smem>>
      %61 = arith.index_cast %60 : i32 to index
      %c0_22 = arith.constant 0 : index
      %62 = vector.load %arg3[%61, %c0_22] : memref<16x128xf32, #tpu.memory_space<vmem>>, vector<1x128xf32>
      %63 = arith.index_cast %57 : i32 to index
      %c0_23 = arith.constant 0 : index
      %64 = vector.load %arg5[%63, %c0_23] : memref<16x128xf32, #tpu.memory_space<vmem>>, vector<1x128xf32>
      tpu.vector_store %arg5[%63, %c0_23], %62 {strides = array<i32>} : memref<16x128xf32, #tpu.memory_space<vmem>>, vector<1x128xf32>,
      %c7_i32 = arith.constant 7 : i32
      %65 = arith.addi %8, %c7_i32 : i32
      %66 = arith.addi %2, %65 : i32
      %67 = arith.index_cast %66 : i32 to index
      %68 = memref.load %arg2[%67] : memref<16xi32, #tpu.memory_space<smem>>
      %69 = arith.index_cast %68 : i32 to index
      %c0_24 = arith.constant 0 : index
      %70 = vector.load %arg3[%69, %c0_24] : memref<16x128xf32, #tpu.memory_space<vmem>>, vector<1x128xf32>
      %71 = arith.index_cast %65 : i32 to index
      %c0_25 = arith.constant 0 : index
      %72 = vector.load %arg5[%71, %c0_25] : memref<16x128xf32, #tpu.memory_space<vmem>>, vector<1x128xf32>
      tpu.vector_store %arg5[%71, %c0_25], %70 {strides = array<i32>} : memref<16x128xf32, #tpu.memory_space<vmem>>, vector<1x128xf32>,
    }
    %c2_i32_1 = arith.constant 2 : i32
    %c0 = arith.constant 0 : index
    %c0_2 = arith.constant 0 : index
    %4 = vector.load %arg5[%c0, %c0_2] : memref<16x128xf32, #tpu.memory_space<vmem>>, vector<16x128xf32>
    %c0_3 = arith.constant 0 : index
    %c0_4 = arith.constant 0 : index
    %5 = vector.load %arg4[%c0_3, %c0_4] : memref<16x128xf32, #tpu.memory_space<vmem>>, vector<16x128xf32>
    %6 = arith.addf %4, %5 : vector<16x128xf32>
    %c0_5 = arith.constant 0 : index
    %c0_6 = arith.constant 0 : index
    %7 = vector.load %arg5[%c0_5, %c0_6] : memref<16x128xf32, #tpu.memory_space<vmem>>, vector<16x128xf32>
    tpu.vector_store %arg5[%c0_5, %c0_6], %6 {strides = array<i32>} : memref<16x128xf32, #tpu.memory_space<vmem>>, vector<16x128xf32>,
    return
  }
  func.func @transform_0(%arg0: i32, %arg1: i32, %arg2: memref<16xi32, #tpu.memory_space<smem>>) -> (i32, i32) {
    %c0_i32 = arith.constant 0 : i32
    %c0_i32_0 = arith.constant 0 : i32
    %c0_i32_1 = arith.constant 0 : i32
    return %c0_i32, %c0_i32_0 : i32, i32
  }
  func.func @transform_1(%arg0: i32, %arg1: i32, %arg2: memref<16xi32, #tpu.memory_space<smem>>) -> (i32, i32) {
    %c0_i32 = arith.constant 0 : i32
    %c0_i32_0 = arith.constant 0 : i32
    return %arg0, %c0_i32 : i32, i32
  }
  func.func @transform_2(%arg0: i32, %arg1: i32, %arg2: memref<16xi32, #tpu.memory_space<smem>>) -> (i32, i32) {
    %c1_i32 = arith.constant 1 : i32
    %0 = arith.muli %arg1, %c1_i32 : i32
    %1 = arith.addi %0, %arg0 : i32
    %c0_i32 = arith.constant 0 : i32
    %c0_i32_0 = arith.constant 0 : i32
    return %1, %c0_i32 : i32, i32
  }
}

</mosaic_0001>

<bundles_post_ra>
// kernel: tpu_custom_call.1
= control target key start
LH: loop header
LB: loop body
LE: loop exit
PB: predicated region body
PF: predicated region fallthrough
CT: control target
= control target key end

     0   :  { %s390_s0 = inlined_call_operand.hbm [shape: s32[16], index: 0, kind: input, shape index: {}]   ;;  %s391_s1 = inlined_call_operand.hbm [shape: f32[16,128], index: 1, kind: input, shape index: {}]   ;;  %s392_s2 = inlined_call_operand.hbm [shape: f32[16,128], index: 2, kind: input, shape index: {}]   ;;  %s393_s3 = inlined_call_operand.hbm [shape: f32[16,128], index: 3, kind: output, shape index: {}]  }
   0x1   :  { %s206_s14 = scalar_lea.hbm %s390_s0, 16 }
   0x2   :  { %p207_p0 = scmp.ne.s32.totalorder %s390_s0, %s206_s14  ;;  %p210_p1 = scmp.lt.u32.totalorder %s206_s14, %s390_s0 }
   0x4   :  { %p212_p2 = pnand %p210_p1, %p207_p0 }
   0x6   :  { %215 = shalt.err (!%p212_p2)  }
   0x7   :  { %s298_s19 = smov [#allocation3]  }
   0x8   :  { %9 = dma.hbm_to_smem %s390_s0, 16, %s298_s19, [#allocation2] }
   0x9   :  { %286 = dma.done.wait [#allocation2], 16 }
   0xa   :  { %287 = vsyncadd [#allocation2], 4294967280 }
   0xb   :  { %11 = sfence }
   0xc   :  { %12 = vsyncpa [#allocation5], 0 }
   0xd   :  { %13 = vsyncpa [#allocation8], 0 }
   0xe   :  { %14 = vsyncpa [#allocation6], 0  ;;  %s299_s22 = smov [#allocation4]   ;;  %s216_s26 = scalar_lea.hbm %s391_s1, 256 }
   0xf   :  { %s20_s23 = sshll.u32 %s299_s22, 4  ;;  %p217_p3 = scmp.ne.s32.totalorder %s391_s1, %s216_s26  ;;  %s21_s23 = int_to_ptr.vmem [resolvable:$true] %s20_s23 }
  0x10   :  { %p220_p4 = scmp.lt.u32.totalorder %s216_s26, %s391_s1 }
  0x12   :  { %p222_p5 = pnand %p220_p4, %p217_p3 }
  0x14   :  { %225 = shalt.err (!%p222_p5)
}
  0x15   :  { %s226_s0 = scalar_lea.vmem %s21_s23, 256  ;;  %p231_p7 = scmp.lt.s32.totalorder %s21_s23, %s21_s23 }
  0x16   :  { %p227_p6 = scmp.ne.s32.totalorder %s21_s23, %s226_s0  ;;  %p232_p8 = scmp.lt.s32.totalorder %s226_s0, %s226_s0 }
  0x18   :  { %p233_p9 = por %p232_p8, %p231_p7 }
  0x1a   :  { %p234_p10 = pnand %p233_p9, %p227_p6 }
  0x1c   :  { %237 = shalt.err (!%p234_p10)
}
  0x1d   :  { %s300_s4 = smov 128   ;;  %s301_s5 = smov 8  }
  0x1e   :  { %26 = dma.hbm_to_vmem [thread:$0]  %s391_s1, 256, %s21_s23, [#allocation5], %s300_s4, %s300_s4, %s301_s5  }
  0x1f   :  { %s302_s8 = smov [#allocation7]   ;;  %s238_s12 = scalar_lea.hbm %s392_s2, 256 }
  0x20   :  { %s32_s9 = sshll.u32 %s302_s8, 4  ;;  %p239_p11 = scmp.ne.s32.totalorder %s392_s2, %s238_s12  ;;  %s33_s9 = int_to_ptr.vmem [resolvable:$true] %s32_s9 }
  0x21   :  { %p242_p12 = scmp.lt.u32.totalorder %s238_s12, %s392_s2 }
  0x23   :  { %p244_p13 = pnand %p242_p12, %p239_p11 }
  0x25   :  { %247 = shalt.err (!%p244_p13)
}
  0x26   :  { %s248_s17 = scalar_lea.vmem %s33_s9, 256  ;;  %p253_p1 = scmp.lt.s32.totalorder %s33_s9, %s33_s9 }
  0x27   :  { %p249_p0 = scmp.ne.s32.totalorder %s33_s9, %s248_s17  ;;  %p254_p2 = scmp.lt.s32.totalorder %s248_s17, %s248_s17 }
  0x29   :  { %p255_p3 = por %p254_p2, %p253_p1 }
  0x2b   :  { %p256_p4 = pnand %p255_p3, %p249_p0 }
  0x2d   :  { %259 = shalt.err (!%p256_p4)
}
  0x2e   :  { %38 = dma.hbm_to_vmem [thread:$0]  %s392_s2, 256, %s33_s9, [#allocation8], %s300_s4, %s300_s4, %s301_s5  }
  0x2f   :  { %288 = dma.done.wait [#allocation5], 256  }
  0x30   :  { %289 = vsyncadd [#allocation5], 4294967040 }
  0x31   :  { %290 = dma.done.wait [#allocation8], 256  }
  0x32   :  { %291 = vsyncadd [#allocation8], 4294967040  ;;  %s366_s19 = smov 0  }
  0x33 LB: > { %s177_s20 = sshll.u32 %s296_s19, 3  ;;  %s54_s19 = sadd.s32 1, %s296_s19   ;;  %s296_s19 = sphi %s366_s19, %s54_s19  }
  0x34   : > { %s57_s21 = sld [smem:[#allocation3 + %s177_s20]]  ;;  %s62_s22 = sadd.s32 1, %s177_s20 }
  0x35   : > { %s69_s23 = sadd.s32 2, %s177_s20  ;;  %s64_s24 = sld [smem:[#allocation3 + %s62_s22]] }
  0x36   : > { %s71_s25 = sld [smem:[#allocation3 + %s69_s23]]  ;;  %s76_s26 = sadd.s32 3, %s177_s20 }
  0x37   : > { %s83_s2 = sadd.s32 4, %s177_s20  ;;  %s78_s27 = sld [smem:[#allocation3 + %s76_s26]] }
  0x38   : > { %s85_s28 = sld [smem:[#allocation3 + %s83_s2]]  ;;  %s90_s29 = sadd.s32 5, %s177_s20 }
  0x39   : > { %s97_s30 = sadd.s32 6, %s177_s20  ;;  %s92_s0 = sld [smem:[#allocation3 + %s90_s29]] }
  0x3a   : > { %s58_s6 = scalar_lea.vmem [#allocation4], %s57_s21  ;;  %s99_s7 = sld [smem:[#allocation3 + %s97_s30]] }
  0x3b   : > { %v59_v0 = vld [vmem:[%s58_s6] sm:$0x1]  ;;  %s104_s8 = sadd.s32 7, %s177_s20  ;;  %s60_s9 = scalar_lea.vmem [#allocation9], %s177_s20 }
  0x3c   : > { %61 = vst [vmem:[%s60_s9] sm:$0x1] %v59_v0  ;;  %s65_s10 = scalar_lea.vmem [#allocation4], %s64_s24  ;;  %s72_s11 = scalar_lea.vmem [#allocation4], %s71_s25 }
  0x3d   : > { %v66_v1 = vld [vmem:[%s65_s10] sm:$0x1]  ;;  %s106_s12 = sld [smem:[#allocation3 + %s104_s8]]  ;;  %s79_s13 = scalar_lea.vmem [#allocation4], %s78_s27 }
  0x3e   : > { %v73_v2 = vld [vmem:[%s72_s11] sm:$0x1]  ;;  %179 = vst [vmem:[%s60_s9 + $0x1] sm:$0x1] %v66_v1  ;;  %s86_s14 = scalar_lea.vmem [#allocation4], %s85_s28  ;;  %p51_p5 = scmp.ge.s32.totalorder %s54_s19, 2  }
  0x3f   : > { %181 = vst [vmem:[%s60_s9 + $0x2] sm:$0x1] %v73_v2  ;;  %v80_v3 = vld [vmem:[%s79_s13] sm:$0x1]  ;;  %s93_s15 = scalar_lea.vmem [#allocation4], %s92_s0  ;;  %v113_v9 = vld [vmem:[#allocation7] sm:$0xff] (%p51_p5) }
  0x40   : > { %v87_v4 = vld [vmem:[%s86_s14] sm:$0x1]  ;;  %183 = vst [vmem:[%s60_s9 + $0x3] sm:$0x1] %v80_v3  ;;  %s100_s16 = scalar_lea.vmem [#allocation4], %s99_s7  ;;  %53 = sbr.rel (!%p51_p5) target bundleno = 51 (0x33), region = 60 }
  0x41   : > { %185 = vst [vmem:[%s60_s9 + $0x4] sm:$0x1] %v87_v4  ;;  %v94_v5 = vld [vmem:[%s93_s15] sm:$0x1]  ;;  %v114_v12 = vld [vmem:[#allocation7 + $0x8] sm:$0xff] (%p51_p5)  ;;  %s303_s1 = smov (%p51_p5), [#allocation9]  }
  0x42   : > { %187 = vst [vmem:[%s60_s9 + $0x5] sm:$0x1] %v94_v5  ;;  %v101_v6 = vld [vmem:[%s100_s16] sm:$0x1]  ;;  %s128_s18 = sshll.u32 (%p51_p5), %s303_s1, 4  ;;  %s129_s18 = int_to_ptr.vmem [resolvable:$true] %s128_s18 }
  0x43   : > { %189 = vst [vmem:[%s60_s9 + $0x6] sm:$0x1] %v101_v6  ;;  %s107_s17 = scalar_lea.vmem [#allocation4], %s106_s12  ;;  %s260_s20 = scalar_lea.vmem (%p51_p5), %s129_s18, 256 }
  0x44   : > { %v108_v7 = vld [vmem:[%s107_s17] sm:$0x1]  ;;  %p261_p6 = scmp.ne.s32.totalorder (%p51_p5), %s129_s18, %s260_s20  ;;  %p265_p7 = scmp.lt.s32.totalorder (%p51_p5), %s129_s18, %s129_s18 }
  0x45   : > { %191 = vst [vmem:[%s60_s9 + $0x7] sm:$0x1] %v108_v7  ;;  %p266_p8 = scmp.lt.s32.totalorder (%p51_p5), %s260_s20, %s260_s20 }
  0x47   :  { %p267_p9 = por %p266_p8, %p265_p7 }
  0x49   :  { %p268_p10 = pnand %p267_p9, %p261_p6 }
  0x4c   :  { %v111_v8 = vld [vmem:[#allocation9] sm:$0xff]  ;;  %v112_v10 = vld [vmem:[#allocation9 + $0x8] sm:$0xff] }
  0x4d   :  { %v115_v11 = vadd.f32 %v113_v9, %v111_v8  ;;  %v116_v13 = vadd.f32 %v114_v12, %v112_v10 }
  0x4f   :  { %117 = vst [vmem:[#allocation9] sm:$0xff] %v115_v11  ;;  %118 = vst [vmem:[#allocation9 + $0x8] sm:$0xff] %v116_v13 }
  0x50   :  { %271 = shalt.err (!%p268_p10)
}
  0x51   :  { %s272_s22 = scalar_lea.hbm %s393_s3, 256 }
  0x52   :  { %p273_p11 = scmp.ne.s32.totalorder %s393_s3, %s272_s22  ;;  %p276_p12 = scmp.lt.u32.totalorder %s272_s22, %s393_s3 }
  0x54   :  { %p278_p13 = pnand %p276_p12, %p273_p11 }
  0x56   :  { %281 = shalt.err (!%p278_p13)
}
  0x57   :  { %134 = dma.vmem_to_hbm [thread:$0]  %s129_s18, 256, %s393_s3, [#allocation6], %s300_s4, %s300_s4, %s301_s5  }
  0x58   :  { %292 = dma.done.wait [#allocation6], 256  }
  0x59   :  { %293 = vsyncadd [#allocation6], 4294967040 }
  0x5a   :  { %138 = vsyncpa [#allocation5], 1 }
  0x5b   :  { %139 = vsyncpa [#allocation8], 1 }
  0x5c   :  { %140 = vsyncpa [#allocation6], 1 }

</bundles_post_ra>
